<compile_context>
chip_gen: v7x
topology: tpu7x:2x2x1
jax: 0.10.0
libtpu: 0.0.40
codegen_flags: <defaults>
</compile_context>

<pallas_src>
import jax
import jax.numpy as jnp
from jax.experimental import pallas as pl
from jax.experimental.pallas import tpu as pltpu

_LANE = 128
_VMEM_BUDGET = 24 * 1024 * 1024  # conservative pipeline footprint target (v7x-safe)


def _round_up(x, m):
    return ((x + m - 1) // m) * m


def _cdiv(a, b):
    return (a + b - 1) // b


def _sublane(dtype):
    """Dtype-aware sublane packing multiple (8 f32 / 16 bf16 / 32 int8-fp8)."""
    itemsize = jnp.dtype(dtype).itemsize
    if itemsize >= 4:
        return 8
    if itemsize == 2:
        return 16
    return 32


def _choose_tn(n):
    """Lane-dense N tile: big (<=512), prefers exact divisors of padded N."""
    np128 = _round_up(n, _LANE)
    base = 512 if np128 >= 1024 else 256
    if np128 <= base:
        return np128
    best_d, best_pad = _LANE, _round_up(np128, _LANE) - np128
    for d in range(base, _LANE - 1, -_LANE):
        pad = _round_up(np128, d) - np128
        if pad <= np128 // 8:
            return d  # largest tile with <=12.5% N padding
        if pad < best_pad:
            best_d, best_pad = d, pad
    return best_d


def _choose_tm(m, sub):
    """M tile: <=512, rounded to the dtype sublane multiple, minimal padding."""
    base = 512 if m >= 1024 else 256
    if m <= base:
        return max(sub, _round_up(m, sub))
    n_tiles = _cdiv(m, base)
    return _round_up(_cdiv(m, n_tiles), sub)


def _choose_tk(k, tn, dtype):
    """Largest K tile whose double-buffered pipeline footprint fits the budget."""
    isz = jnp.dtype(dtype).itemsize
    tm_hi = 512                                 # worst-case tm assumed for the budget
    fixed = 2 * tm_hi * tn * isz                # double-buffered output tile
    fixed += tm_hi * tn * 4                     # f32 scratch accumulator (worst case)
    fixed += 2 * tn * 4                         # bias tile (negligible)
    per_k = 2 * (tm_hi + tn) * isz              # double-buffered x and w per K element
    cap = max(_LANE, ((_VMEM_BUDGET - fixed) // per_k) // _LANE * _LANE)
    kp128 = _round_up(k, _LANE)
    if kp128 <= cap:
        return kp128                            # single reduction step
    steps = _cdiv(kp128, cap)
    tk = _round_up(_cdiv(kp128, steps), _LANE)
    while tk > cap:
        steps += 1
        tk = _round_up(_cdiv(kp128, steps), _LANE)
    return tk


def _largest_proper_divisor(total, granularity):
    """Largest multiple of `granularity` that divides `total` and is < total."""
    best = None
    d = granularity
    while d < total:
        if total % d == 0:
            best = d
        d += granularity
    return best


# ----------------------------- kernels -------------------------------------------

def _kernel_f32_bias(x_ref, w_ref, b_ref, o_ref):
    # f32 output: accumulate directly into the resident output block (no scratch).
    @pl.when(pl.program_id(2) == 0)
    def _init():
        o_ref[...] = jnp.broadcast_to(b_ref[...], o_ref.shape)

    o_ref[...] += jnp.dot(x_ref[...], w_ref[...], preferred_element_type=jnp.float32)


def _kernel_f32_nobias(x_ref, w_ref, o_ref):
    @pl.when(pl.program_id(2) == 0)
    def _init():
        o_ref[...] = jnp.zeros_like(o_ref)

    o_ref[...] += jnp.dot(x_ref[...], w_ref[...], preferred_element_type=jnp.float32)


def _kernel_acc_bias(x_ref, w_ref, b_ref, o_ref, acc_ref):
    # Narrow output dtype: f32 scratch accumulator, cast + store on the last K step.
    k = pl.program_id(2)

    @pl.when(k == 0)
    def _init():
        acc_ref[...] = jnp.zeros_like(acc_ref)

    acc_ref[...] += jnp.dot(x_ref[...], w_ref[...], preferred_element_type=jnp.float32)

    @pl.when(k == pl.num_programs(2) - 1)
    def _fin():
        o_ref[...] = (acc_ref[...] + b_ref[...]).astype(o_ref.dtype)


def _kernel_acc_nobias(x_ref, w_ref, o_ref, acc_ref):
    k = pl.program_id(2)

    @pl.when(k == 0)
    def _init():
        acc_ref[...] = jnp.zeros_like(acc_ref)

    acc_ref[...] += jnp.dot(x_ref[...], w_ref[...], preferred_element_type=jnp.float32)

    @pl.when(k == pl.num_programs(2) - 1)
    def _fin():
        o_ref[...] = acc_ref[...].astype(o_ref.dtype)


# ----------------------------- wrapper --------------------------------------------

class PrepackedLinearWeight:
    """Weight pre-transposed to (Kp, Np) and padded once at load time."""

    def __init__(self, w_kn, out_features, in_features, tn, tk):
        self.w_kn = w_kn
        self.out_features = out_features
        self.in_features = in_features
        self.tn = tn
        self.tk = tk


def prepack_ipex_linear_weight(weight):
    """Pre-transpose + pad a (out_features, in_features) weight; do this once."""
    n, k = weight.shape
    tn = _choose_tn(n)
    np_ = _round_up(n, tn)
    tk = _choose_tk(k, tn, weight.dtype)
    kp = tk * _cdiv(_round_up(k, _LANE), tk)
    w_kn = weight.T  # (K, N): out_features on the lane axis -> unmasked vst stores
    if (kp, np_) != (k, n):
        w_kn = jnp.pad(w_kn, ((0, kp - k), (0, np_ - n)))
    return PrepackedLinearWeight(w_kn, n, k, tn, tk)


def ipex_linear(x, weight, bias=None):
    """Equivalent of torch.nn.functional.linear(x, weight, bias).

    x:      (..., in_features)
    weight: (out_features, in_features) array, or a PrepackedLinearWeight
    bias:   (out_features,) or None
    """
    if not isinstance(weight, PrepackedLinearWeight):
        weight = prepack_ipex_linear_weight(weight)

    *lead, k_in = x.shape
    assert k_in == weight.in_features, "in_features mismatch"
    n_out = weight.out_features
    kp, np_ = weight.w_kn.shape
    tn, tk = weight.tn, weight.tk

    compute_dtype = weight.w_kn.dtype
    x2d = x.reshape(-1, k_in)
    if x2d.dtype != compute_dtype:
        x2d = x2d.astype(compute_dtype)  # matches the IPEX TPP path: x.to(weight.dtype)
    m = x2d.shape[0]

    sub = _sublane(compute_dtype)
    tm = _choose_tm(m, sub)
    mp = tm * _cdiv(m, tm)

    grid_i, grid_j, grid_k = mp // tm, np_ // tn, kp // tk

    # v7x megacore: keep >=2 parallel grid iterations so both TensorCores get work.
    if grid_i == 1 and grid_j == 1:
        if np_ >= 2 * _LANE:
            d = _largest_proper_divisor(np_, _LANE)
            if d is not None:
                tn, grid_j = d, np_ // d
        elif mp >= 2 * 64:
            d = _largest_proper_divisor(mp, sub)
            if d is not None:
                tm, grid_i = d, mp // d

    if (mp, kp) != (m, k_in):
        x2d = jnp.pad(x2d, ((0, mp - m), (0, kp - k_in)))

    out_dtype = compute_dtype
    direct_f32 = out_dtype == jnp.float32
    have_bias = bias is not None

    in_specs = [
        pl.BlockSpec((tm, tk), lambda i, j, k: (i, k)),  # x  M/K tile
        pl.BlockSpec((tk, tn), lambda i, j, k: (k, j)),  # w  K/N tile (prepacked)
    ]
    operands = [x2d, weight.w_kn]
    if have_bias:
        b_p = bias.astype(jnp.float32)
        if np_ != n_out:
            b_p = jnp.pad(b_p, (0, np_ - n_out))
        operands.append(b_p.reshape(1, np_))
        in_specs.append(pl.BlockSpec((1, tn), lambda i, j, k: (0, j)))

    if direct_f32:
        kernel = _kernel_f32_bias if have_bias else _kernel_f32_nobias
        scratch = []
    else:
        kernel = _kernel_acc_bias if have_bias else _kernel_acc_nobias
        scratch = [pltpu.VMEM((tm, tn), jnp.float32)]

    isz = jnp.dtype(compute_dtype).itemsize
    osz = jnp.dtype(out_dtype).itemsize
    cost = pl.CostEstimate(
        flops=2 * mp * kp * np_,
        transcendentals=0,
        bytes_accessed=(
            grid_j * mp * kp * isz          # x re-streamed once per N tile
            + grid_i * kp * np_ * isz       # w re-streamed once per M tile
            + mp * np_ * osz                # output written once
            + (np_ * 4 if have_bias else 0)
        ),
    )

    # NOTE(v5e): if a trace shows exposed DMA on K steps, pipeline_mode=pl.Buffered(3)
    # on the x / w specs can hide it at the cost of extra VMEM.
    out2d = pl.pallas_call(
        kernel,
        out_shape=jax.ShapeDtypeStruct((mp, np_), out_dtype),
        grid_spec=pltpu.PrefetchScalarGridSpec(
            num_scalar_prefetch=0,
            grid=(grid_i, grid_j, grid_k),
            in_specs=in_specs,
            out_specs=pl.BlockSpec((tm, tn), lambda i, j, k: (i, j)),
            scratch_shapes=scratch,
        ),
        compiler_params=pltpu.CompilerParams(
            dimension_semantics=("parallel", "parallel", "arbitrary"),
            vmem_limit_bytes=32 * 1024 * 1024,
        ),
        cost_estimate=cost,
    )(*operands)

    out2d = out2d[:m, :n_out]
    return out2d.reshape(*lead, n_out)


if __name__ == "__main__":
    key = jax.random.PRNGKey(0)
    kx, kw, kb, kx2, kw2, kb2, kx3, kw3, kb3 = jax.random.split(key, 9)

    # --- Small shapes consistent with a linear forward: (2, 8, 32) -> (2, 8, 64) ---
    batch, seq, in_features, out_features = 2, 8, 32, 64
    x = jax.random.normal(kx, (batch, seq, in_features), dtype=jnp.float32)
    weight = jax.random.normal(kw, (out_features, in_features), dtype=jnp.float32) * 0.05
    bias = jax.random.normal(kb, (out_features,), dtype=jnp.float32) * 0.05

    w_packed = prepack_ipex_linear_weight(weight)  # once, at "model load" time
    out = jax.block_until_ready(ipex_linear(x, w_packed, bias))
    ref = x @ weight.T + bias
    assert out.shape == (batch, seq, out_features)
    assert jnp.allclose(out, ref, atol=1e-4, rtol=1e-4)

    # --- Ragged shapes: tight padding, multi-tile grid, raw-weight convenience path ---
    M2, K2, N2 = 300, 200, 192
    x2 = jax.random.normal(kx2, (M2, K2), dtype=jnp.float32)
    w2 = jax.random.normal(kw2, (N2, K2), dtype=jnp.float32) * 0.05
    b2 = jax.random.normal(kb2, (N2,), dtype=jnp.float32) * 0.05
    out2 = jax.block_until_ready(ipex_linear(x2, w2, b2))
    ref2 = x2 @ w2.T + b2
    assert out2.shape == (M2, N2)
    assert jnp.allclose(out2, ref2, atol=1e-4, rtol=1e-4)

    # --- bias=None path (separate kernel, no zero-bias DMA) ---
    out2n = jax.block_until_ready(ipex_linear(x2, w2, None))
    assert jnp.allclose(out2n, x2 @ w2.T, atol=1e-4, rtol=1e-4)

    # --- bf16 path (IPEX TPP branch casts x to weight dtype): exercises the f32
    #     scratch-accumulator kernel and dtype-aware sublane rounding ---
    xb = jax.random.normal(kx3, (4, 8, 32), dtype=jnp.bfloat16)
    wb = (jax.random.normal(kw3, (64, 32), dtype=jnp.float32) * 0.05).astype(jnp.bfloat16)
    bb = (jax.random.normal(kb3, (64,), dtype=jnp.float32) * 0.05).astype(jnp.bfloat16)
    outb = jax.block_until_ready(ipex_linear(xb, prepack_ipex_linear_weight(wb), bb))
    refb = xb.astype(jnp.float32) @ wb.astype(jnp.float32).T + bb.astype(jnp.float32)
    assert outb.dtype == jnp.bfloat16
    assert jnp.allclose(outb.astype(jnp.float32), refb, atol=5e-2, rtol=5e-2)

    print("KERNEL_OK")
</pallas_src>

<mosaic_0001>
module attributes {stable_mosaic.version = 11 : i64} {
  func.func @_kernel_f32_bias(%arg0: i32, %arg1: i32, %arg2: i32, %arg3: memref<16x128xf32, #tpu.memory_space<vmem>>, %arg4: memref<128x128xf32, #tpu.memory_space<vmem>>, %arg5: memref<1x128xf32, #tpu.memory_space<vmem>>, %arg6: memref<16x128xf32, #tpu.memory_space<vmem>>) attributes {dimension_semantics = [#tpu.dimension_semantics<parallel>, #tpu.dimension_semantics<parallel>, #tpu.dimension_semantics<arbitrary>], iteration_bounds = array<i64: 1, 1, 1>, scalar_prefetch = 0 : i64, scratch_operands = 0 : i64, tpu.core_type = #tpu.core_type<tc>, window_params = [{transform_indices = @transform_0, window_bounds = array<i64: 16, 128>}, {transform_indices = @transform_1, window_bounds = array<i64: 128, 128>}, {transform_indices = @transform_2, window_bounds = array<i64: 1, 128>}, {transform_indices = @transform_3, window_bounds = array<i64: 16, 128>}]} {
    %c0_i32 = arith.constant 0 : i32
    %0 = arith.cmpi eq, %arg2, %c0_i32 : i32
    %1 = arith.extui %0 : i1 to i32
    %c0_i32_0 = arith.constant 0 : i32
    %2 = arith.cmpi ne, %1, %c0_i32_0 : i32
    scf.if %2 {
      %c0_8 = arith.constant 0 : index
      %c0_9 = arith.constant 0 : index
      %9 = vector.load %arg5[%c0_8, %c0_9] : memref<1x128xf32, #tpu.memory_space<vmem>>, vector<1x128xf32>
      %10 = vector.shape_cast %9 : vector<1x128xf32> to vector<1x128xf32>
      %11 = vector.broadcast %10 : vector<1x128xf32> to vector<16x128xf32>
      %c0_10 = arith.constant 0 : index
      %c0_11 = arith.constant 0 : index
      %12 = vector.load %arg6[%c0_10, %c0_11] : memref<16x128xf32, #tpu.memory_space<vmem>>, vector<16x128xf32>
      tpu.vector_store %arg6[%c0_10, %c0_11], %11 {strides = array<i32>} : memref<16x128xf32, #tpu.memory_space<vmem>>, vector<16x128xf32>,
    } else {
    }
    %c0 = arith.constant 0 : index
    %c0_1 = arith.constant 0 : index
    %3 = vector.load %arg6[%c0, %c0_1] : memref<16x128xf32, #tpu.memory_space<vmem>>, vector<16x128xf32>
    %c0_2 = arith.constant 0 : index
    %c0_3 = arith.constant 0 : index
    %4 = vector.load %arg3[%c0_2, %c0_3] : memref<16x128xf32, #tpu.memory_space<vmem>>, vector<16x128xf32>
    %c0_4 = arith.constant 0 : index
    %c0_5 = arith.constant 0 : index
    %5 = vector.load %arg4[%c0_4, %c0_5] : memref<128x128xf32, #tpu.memory_space<vmem>>, vector<128x128xf32>
    %cst = arith.constant dense<0.000000e+00> : vector<16x128xf32>
    %6 = tpu.matmul %4, %5, %cst {dimension_numbers = #tpu.dot_dimension_numbers<[1], [0], [0], [1], [0, 0, 1, 1], [], []>} : vector<16x128xf32>, vector<128x128xf32>, vector<16x128xf32> -> vector<16x128xf32>
    %7 = arith.addf %3, %6 : vector<16x128xf32>
    %c0_6 = arith.constant 0 : index
    %c0_7 = arith.constant 0 : index
    %8 = vector.load %arg6[%c0_6, %c0_7] : memref<16x128xf32, #tpu.memory_space<vmem>>, vector<16x128xf32>
    tpu.vector_store %arg6[%c0_6, %c0_7], %7 {strides = array<i32>} : memref<16x128xf32, #tpu.memory_space<vmem>>, vector<16x128xf32>,
    return
  }
  func.func @transform_0(%arg0: i32, %arg1: i32, %arg2: i32) -> (i32, i32) {
    %c0_i32 = arith.constant 0 : i32
    return %arg0, %arg2 : i32, i32
  }
  func.func @transform_1(%arg0: i32, %arg1: i32, %arg2: i32) -> (i32, i32) {
    %c0_i32 = arith.constant 0 : i32
    return %arg2, %arg1 : i32, i32
  }
  func.func @transform_2(%arg0: i32, %arg1: i32, %arg2: i32) -> (i32, i32) {
    %c0_i32 = arith.constant 0 : i32
    %c0_i32_0 = arith.constant 0 : i32
    return %c0_i32, %arg1 : i32, i32
  }
  func.func @transform_3(%arg0: i32, %arg1: i32, %arg2: i32) -> (i32, i32) {
    %c0_i32 = arith.constant 0 : i32
    return %arg0, %arg1 : i32, i32
  }
}

</mosaic_0001>

<bundles_post_ra>
// kernel: tpu_custom_call.1
= control target key start
LH: loop header
LB: loop body
LE: loop exit
PB: predicated region body
PF: predicated region fallthrough
CT: control target
= control target key end

     0   :  { %8 = vsyncpa [#allocation3], 0  ;;  %s409_s0 = inlined_call_operand.hbm [shape: f32[16,128], index: 0, kind: input, shape index: {}]   ;;  %s410_s1 = inlined_call_operand.hbm [shape: f32[128,128], index: 1, kind: input, shape index: {}]   ;;  %s411_s2 = inlined_call_operand.vmem [shape: f32[1,128], index: 2, kind: input, shape index: {}]   ;;  %s412_s3 = inlined_call_operand.hbm [shape: f32[16,128], index: 3, kind: output, shape index: {}]  }
   0x1   :  { %9 = vsyncpa [#allocation6], 0 }
   0x2   :  { %10 = vsyncpa [#allocation4], 0  ;;  %s336_s12 = smov [#allocation2]   ;;  %s264_s16 = scalar_lea.hbm %s409_s0, 256 }
   0x3   :  { %s16_s13 = sshll.u32 %s336_s12, 4  ;;  %p265_p0 = scmp.ne.s32.totalorder %s409_s0, %s264_s16  ;;  %s17_s13 = int_to_ptr.vmem [resolvable:$true] %s16_s13 }
   0x4   :  { %p268_p1 = scmp.lt.u32.totalorder %s264_s16, %s409_s0 }
   0x6   :  { %p270_p2 = pnand %p268_p1, %p265_p0 }
   0x8   :  { %273 = shalt.err (!%p270_p2)
}
   0x9   :  { %s274_s21 = scalar_lea.vmem %s17_s13, 256  ;;  %p279_p4 = scmp.lt.s32.totalorder %s17_s13, %s17_s13 }
   0xa   :  { %p275_p3 = scmp.ne.s32.totalorder %s17_s13, %s274_s21  ;;  %p280_p5 = scmp.lt.s32.totalorder %s274_s21, %s274_s21 }
   0xc   :  { %p281_p6 = por %p280_p5, %p279_p4 }
   0xe   :  { %p282_p7 = pnand %p281_p6, %p275_p3 }
  0x10   :  { %285 = shalt.err (!%p282_p7)
}
  0x11   :  { %s337_s22 = smov 128   ;;  %s338_s23 = smov 8  }
  0x12   :  { %22 = dma.hbm_to_vmem [thread:$0]  %s409_s0, 256, %s17_s13, [#allocation3], %s337_s22, %s337_s22, %s338_s23  }
  0x13   :  { %s339_s26 = smov [#allocation5]   ;;  %s286_s30 = scalar_lea.hbm %s410_s1, 2048 }
  0x14   :  { %s28_s27 = sshll.u32 %s339_s26, 4  ;;  %p287_p8 = scmp.ne.s32.totalorder %s410_s1, %s286_s30  ;;  %s29_s27 = int_to_ptr.vmem [resolvable:$true] %s28_s27 }
  0x15   :  { %p290_p9 = scmp.lt.u32.totalorder %s286_s30, %s410_s1 }
  0x17   :  { %p292_p10 = pnand %p290_p9, %p287_p8 }
  0x19   :  { %295 = shalt.err (!%p292_p10)
}
  0x1a   :  { %s296_s8 = scalar_lea.vmem %s29_s27, 2048  ;;  %p301_p12 = scmp.lt.s32.totalorder %s29_s27, %s29_s27 }
  0x1b   :  { %p297_p11 = scmp.ne.s32.totalorder %s29_s27, %s296_s8  ;;  %p302_p13 = scmp.lt.s32.totalorder %s296_s8, %s296_s8 }
  0x1d   :  { %p303_p0 = por %p302_p13, %p301_p12 }
  0x1f   :  { %p304_p1 = pnand %p303_p0, %p297_p11 }
  0x21   :  { %307 = shalt.err (!%p304_p1)
}
  0x22   :  { %34 = dma.hbm_to_vmem [thread:$0]  %s410_s1, 2048, %s29_s27, [#allocation6], %s337_s22, %s337_s22, %s338_s23  }
  0x23   :  { %330 = dma.done.wait [#allocation3], 256  }
  0x24   :  { %331 = vsyncadd [#allocation3], 4294967040 }
  0x25   :  { %332 = dma.done.wait [#allocation6], 2048  }
  0x26   :  { %333 = vsyncadd [#allocation6], 4294965248  ;;  %v60_v0 = vld [vmem:[#allocation5] sm:$0xff]  ;;  %v61_v1 = vld [vmem:[#allocation5 + $0x8] sm:$0xff]  ;;  %s340_s11 = smov [#allocation7]  }
  0x27   :  { %v62_v2 = vld [vmem:[#allocation5 + $0x10] sm:$0xff]  ;;  %v227_v3 = vpack.c.bf16 %v61_v1, %v60_v0  ;;  %v63_v4 = vld [vmem:[#allocation5 + $0x18] sm:$0xff]  ;;  %v64_v6 = vld [vmem:[#allocation5 + $0x20] sm:$0xff]  ;;  %s160_s12 = sshll.u32 %s340_s11, 4  ;;  %s161_s12 = int_to_ptr.vmem [resolvable:$true] %s160_s12 }
  0x28   :  { %v231_v5 = vpack.c.bf16 %v63_v4, %v62_v2  ;;  %v65_v7 = vld [vmem:[#allocation5 + $0x28] sm:$0xff]  ;;  %v58_v9 = vld [vmem:[#allocation2] sm:$0xff]  ;;  %v67_v11 = vld [vmem:[#allocation5 + $0x38] sm:$0xff]  ;;  %s308_s13 = scalar_lea.vmem %s161_s12, 256  ;;  %p313_p3 = scmp.lt.s32.totalorder %s161_s12, %s161_s12 }
  0x29   :  { %228 = vmatprep.subr.bf16.mxu0 %v227_v3  ;;  %v235_v8 = vpack.c.bf16 %v65_v7, %v64_v6  ;;  %v66_v10 = vld [vmem:[#allocation5 + $0x30] sm:$0xff]  ;;  %224 = vmatprep.mubr.f32.mxu0 %v58_v9  ;;  %v68_v13 = vld [vmem:[#allocation5 + $0x40] sm:$0xff]  ;;  %v69_v14 = vld [vmem:[#allocation5 + $0x48] sm:$0xff]  ;;  %p309_p2 = scmp.ne.s32.totalorder %s161_s12, %s308_s13  ;;  %p314_p4 = scmp.lt.s32.totalorder %s308_s13, %s308_s13 }
  0x2a   :  { %230 = vmatpush3.bf16.msra.mxu0 %v227_v3  ;;  %v239_v12 = vpack.c.bf16 %v67_v11, %v66_v10  ;;  %v243_v15 = vpack.c.bf16 %v69_v14, %v68_v13  ;;  %v70_v16 = vld [vmem:[#allocation5 + $0x50] sm:$0xff]  ;;  %v71_v17 = vld [vmem:[#allocation5 + $0x58] sm:$0xff]  ;;  %v72_v19 = vld [vmem:[#allocation5 + $0x60] sm:$0xff] }
  0x2b   :  { %232 = vmatprep.subr.bf16.mxu0 %v231_v5  ;;  %v247_v18 = vpack.c.bf16 %v71_v17, %v70_v16  ;;  %v73_v20 = vld [vmem:[#allocation5 + $0x68] sm:$0xff]  ;;  %v74_v22 = vld [vmem:[#allocation5 + $0x70] sm:$0xff]  ;;  %v75_v23 = vld [vmem:[#allocation5 + $0x78] sm:$0xff]  ;;  %p315_p5 = por %p314_p4, %p313_p3 }
  0x2c   :  { %v251_v21 = vpack.c.bf16 %v73_v20, %v72_v19  ;;  %v255_v24 = vpack.c.bf16 %v75_v23, %v74_v22  ;;  %v59_v25 = vld [vmem:[#allocation2 + $0x8] sm:$0xff]  ;;  %v173_v26 = vld [vmem:[%s411_s2] ss:$0 sm:$0xff] }
  0x2d   :  { %p316_p6 = pnand %p315_p5, %p309_p2 }
  0x2e   :  { %234 = vmatpush3.bf16.msra.mxu0 %v231_v5 }
  0x2f   :  { %236 = vmatprep.subr.bf16.mxu0 %v235_v8 }
  0x32   :  { %238 = vmatpush3.bf16.msra.mxu0 %v235_v8 }
  0x33   :  { %240 = vmatprep.subr.bf16.mxu0 %v239_v12 }
  0x36   :  { %242 = vmatpush3.bf16.msra.mxu0 %v239_v12 }
  0x37   :  { %244 = vmatprep.subr.bf16.mxu0 %v243_v15 }
  0x3a   :  { %246 = vmatpush3.bf16.msra.mxu0 %v243_v15 }
  0x3b   :  { %248 = vmatprep.subr.bf16.mxu0 %v247_v18 }
  0x3e   :  { %250 = vmatpush3.bf16.msra.mxu0 %v247_v18 }
  0x3f   :  { %252 = vmatprep.subr.bf16.mxu0 %v251_v21 }
  0x42   :  { %254 = vmatpush3.bf16.msra.mxu0 %v251_v21 }
  0x43   :  { %256 = vmatprep.subr.bf16.mxu0 %v255_v24 }
  0x46   :  { %258 = vmatpush3.bf16.msra.mxu0 %v255_v24 }
  0x49   :  { %225 = vmatmul.mubr.f32.vlgmr.msra.gmra.mrb[0].mxu0 %v59_v25 }
 0x11c   :  { %v226_v27 = vpop.f32.mrb[0].mxu0 }
 0x11d   :  { %v152_v28 = vadd.f32 %v226_v27, %v173_v26  ;;  %v142_v29 = vpop.f32.mrb[1].mxu0 }
 0x11e   :  { %v151_v30 = vadd.f32 %v173_v26, %v142_v29 }
 0x11f   :  { %154 = vst [vmem:[#allocation7 + $0x8] sm:$0xff] %v152_v28 }
 0x120   :  { %153 = vst [vmem:[#allocation7] sm:$0xff] %v151_v30 }
 0x121   :  { %319 = shalt.err (!%p316_p6)
}
 0x122   :  { %s320_s2 = scalar_lea.hbm %s412_s3, 256 }
 0x123   :  { %p321_p7 = scmp.ne.s32.totalorder %s412_s3, %s320_s2  ;;  %p324_p8 = scmp.lt.u32.totalorder %s320_s2, %s412_s3 }
 0x125   :  { %p326_p9 = pnand %p324_p8, %p321_p7 }
 0x127   :  { %329 = shalt.err (!%p326_p9)
}
 0x128   :  { %166 = dma.vmem_to_hbm [thread:$0]  %s161_s12, 256, %s412_s3, [#allocation4], %s337_s22, %s337_s22, %s338_s23  }
 0x129   :  { %334 = dma.done.wait [#allocation4], 256  }
 0x12a   :  { %335 = vsyncadd [#allocation4], 4294967040 }
 0x12b   :  { %170 = vsyncpa [#allocation3], 1 }
 0x12c   :  { %171 = vsyncpa [#allocation6], 1 }
 0x12d   :  { %172 = vsyncpa [#allocation4], 1 }

</bundles_post_ra>
